<compile_context>
chip_gen: v7x
topology: tpu7x:2x2x1
jax: 0.10.0
libtpu: 0.0.40
codegen_flags: <defaults>
</compile_context>

<pallas_src>
import functools

import jax
import jax.numpy as jnp
from jax.experimental import pallas as pl
from jax.experimental.pallas import tpu as pltpu


def _warp_mask_kernel(x_ref, coord_ref, warp_ref, mask_ref, *, H, W):
    """One (batch, output-pixel-tile) per grid step.

    x_ref:     (1, C, H, W)  full source image for this batch element (VMEM resident)
    coord_ref: (1, 2, T)     pixel-space sample coords (row 0 = x/width, row 1 = y/height)
    warp_ref:  (1, C, T)     masked warped output
    mask_ref:  (1, 1, T)     binary validity mask
    """
    C = x_ref.shape[1]
    T = coord_ref.shape[2]

    coords = coord_ref[0]                      # (2, T)
    sx = coords[0:1, :]                        # (1, T) sample x (width) coordinate, pixels
    sy = coords[1:2, :]                        # (1, T) sample y (height) coordinate, pixels

    x0f = jnp.floor(sx)
    y0f = jnp.floor(sy)
    wx1 = sx - x0f
    wx0 = 1.0 - wx1
    wy1 = sy - y0f
    wy0 = 1.0 - wy1

    x0 = x0f.astype(jnp.int32)
    y0 = y0f.astype(jnp.int32)
    x1 = x0 + 1
    y1 = y0 + 1

    # Separable one-hot weight matrices (2 nonzeros per output column).  Out-of-bounds tap
    # indices never match the [0, W)/[0, H) iota, so zero padding falls out for free.
    col_iota = jax.lax.broadcasted_iota(jnp.int32, (W, T), 0)
    row_iota = jax.lax.broadcasted_iota(jnp.int32, (H, T), 0)
    wx_mat = (jnp.where(col_iota == x0, wx0, 0.0)
              + jnp.where(col_iota == x1, wx1, 0.0))           # (W, T) f32
    wy_mat = (jnp.where(row_iota == y0, wy0, 0.0)
              + jnp.where(row_iota == y1, wy1, 0.0))           # (H, T) f32
    wx_b = wx_mat.astype(jnp.bfloat16)                         # bf16 MXU operand

    # grid_sample(ones) with zero padding is exactly separable.
    inx0 = (x0 >= 0) & (x0 < W)
    inx1 = (x1 >= 0) & (x1 < W)
    iny0 = (y0 >= 0) & (y0 < H)
    iny1 = (y1 >= 0) & (y1 < H)
    wxsum = jnp.where(inx0, wx0, 0.0) + jnp.where(inx1, wx1, 0.0)
    wysum = jnp.where(iny0, wy0, 0.0) + jnp.where(iny1, wy1, 0.0)
    mask = ((wysum * wxsum) >= 1.0 - 1e-6).astype(jnp.float32)  # (1, T)

    # Per channel: MXU contracts the width axis, VPU multiply + sublane reduce contracts
    # the height axis.  (Static unroll over C keeps every op strictly 2-D / lane-dense.)
    rows = []
    for c in range(C):
        x_c = x_ref[0, c].astype(jnp.bfloat16)                              # (H, W)
        t_c = jnp.dot(x_c, wx_b, preferred_element_type=jnp.float32)        # (H, T) f32
        rows.append(jnp.sum(t_c * wy_mat, axis=0, keepdims=True))           # (1, T)
    x_warp = jnp.concatenate(rows, axis=0) if C > 1 else rows[0]            # (C, T)

    warp_ref[0] = (x_warp * mask).astype(warp_ref.dtype)  # mask broadcast over channels
    mask_ref[0] = mask.astype(mask_ref.dtype)


def _pick_out_tile(hwp):
    """Largest lane-aligned tile <= 512 dividing the (128-padded) output pixel count."""
    for t in (512, 384, 256, 128):
        if hwp % t == 0:
            return t
    return 128  # unreachable: hwp is always a multiple of 128


def warping_layer_flow_w_mask(x, flow, *, align_corners=True, broadcast_mask=True):
    """Forward pass of WarpingLayer_Flow_W_Mask.

    x:    (N, C, H, W) float32
    flow: (N, 2, H, W) float32  (channel 0 = x/width flow, channel 1 = y/height flow)
    returns (x_warp * mask, mask) as float32; mask is (N, C, H, W) if broadcast_mask else
    (N, 1, H, W) (values are identical across channels either way).

    align_corners=True matches the module's grid construction (linspace(-1,1), 2/(W-1)
    flow scaling); set False to mimic modern PyTorch grid_sample's default unnormalize.
    """
    N, C, H, W = x.shape
    assert flow.shape == (N, 2, H, W), flow.shape
    HW = H * W
    x = x.astype(jnp.float32)
    flow = flow.astype(jnp.float32)

    # Pixel-space sample coordinates (tiny elementwise prologue).
    jj = jnp.arange(W, dtype=jnp.float32)[None, None, :]
    ii = jnp.arange(H, dtype=jnp.float32)[None, :, None]
    if align_corners:
        sx = flow[:, 0] + jj                       # == j + flow_x
        sy = flow[:, 1] + ii                       # == i + flow_y
    else:
        gx = (jj + flow[:, 0]) * (2.0 / max(W - 1, 1)) - 1.0
        gy = (ii + flow[:, 1]) * (2.0 / max(H - 1, 1)) - 1.0
        sx = ((gx + 1.0) * W - 1.0) * 0.5
        sy = ((gy + 1.0) * H - 1.0) * 0.5
    coords = jnp.stack([sx, sy], axis=1).reshape(N, 2, HW)

    # Lane-align the output-pixel axis.  Padded coords sample far out of bounds -> zero
    # weights and zero mask; the padded lanes are sliced off below.  Never fall back to
    # a T = HW tile.
    HWp = ((HW + 127) // 128) * 128
    if HWp != HW:
        coords = jnp.pad(coords, ((0, 0), (0, 0), (0, HWp - HW)),
                         constant_values=-10.0)

    T = _pick_out_tile(HWp)
    ntiles = HWp // T

    # Rough per-step VMEM estimate (bytes): double-buffered blocks + in-kernel temporaries.
    est = (2 * C * H * W * 4            # x block (f32, double buffered)
           + 2 * 2 * T * 4              # coords block
           + 2 * (C + 1) * T * 4        # output blocks
           + (2 * W + H) * T * 4        # iotas + separable weight matrices
           + (H + C + 8) * T * 4)       # matmul result / accumulator slack
    vmem_limit = int(min(48 * 1024 * 1024, max(16 * 1024 * 1024, 2 * est)))
    # TODO(synk): for very large C*H*W (full-resolution images) the resident x block should
    # be chunked over source rows with a trailing "arbitrary" reduction grid axis.

    kernel = functools.partial(_warp_mask_kernel, H=H, W=W)
    warp_flat, mask_flat = pl.pallas_call(
        kernel,
        out_shape=(
            jax.ShapeDtypeStruct((N, C, HWp), jnp.float32),
            jax.ShapeDtypeStruct((N, 1, HWp), jnp.float32),
        ),
        grid=(N, ntiles),
        in_specs=[
            pl.BlockSpec((1, C, H, W), lambda n, t: (n, 0, 0, 0)),  # resident per batch
            pl.BlockSpec((1, 2, T), lambda n, t: (n, 0, t)),
        ],
        out_specs=(
            pl.BlockSpec((1, C, T), lambda n, t: (n, 0, t)),
            pl.BlockSpec((1, 1, T), lambda n, t: (n, 0, t)),
        ),
        compiler_params=pltpu.CompilerParams(
            dimension_semantics=("parallel", "parallel"),
            vmem_limit_bytes=vmem_limit),
    )(x, coords)

    x_warp_masked = warp_flat[:, :, :HW].reshape(N, C, H, W)
    mask = mask_flat[:, :, :HW].reshape(N, 1, H, W)
    if broadcast_mask:
        mask = jnp.broadcast_to(mask, (N, C, H, W))
    return x_warp_masked, mask


def _reference(x, flow):
    """Pure-JAX (XLA gather) reference of the same semantics, for validation."""
    N, C, H, W = x.shape
    jj = jnp.arange(W, dtype=jnp.float32)[None, None, :]
    ii = jnp.arange(H, dtype=jnp.float32)[None, :, None]
    sx = flow[:, 0] + jj
    sy = flow[:, 1] + ii
    x0f = jnp.floor(sx)
    y0f = jnp.floor(sy)
    wx1 = sx - x0f
    wx0 = 1.0 - wx1
    wy1 = sy - y0f
    wy0 = 1.0 - wy1
    x0 = x0f.astype(jnp.int32)
    y0 = y0f.astype(jnp.int32)
    x1 = x0 + 1
    y1 = y0 + 1

    def gather(xb, yi, xi):          # xb (C,H,W), yi/xi (H,W) -> (C,H,W)
        return xb[:, yi, xi]

    def tap(yi, xi, w):
        valid = (yi >= 0) & (yi < H) & (xi >= 0) & (xi < W)
        yc = jnp.clip(yi, 0, H - 1)
        xc = jnp.clip(xi, 0, W - 1)
        vals = jax.vmap(gather)(x, yc, xc)          # (N,C,H,W)
        wv = jnp.where(valid, w, 0.0)               # (N,H,W)
        return vals * wv[:, None], wv

    v00, w00 = tap(y0, x0, wy0 * wx0)
    v01, w01 = tap(y0, x1, wy0 * wx1)
    v10, w10 = tap(y1, x0, wy1 * wx0)
    v11, w11 = tap(y1, x1, wy1 * wx1)
    warp = v00 + v01 + v10 + v11
    msum = w00 + w01 + w10 + w11
    mask = jnp.broadcast_to((msum >= 1.0).astype(jnp.float32)[:, None], x.shape)
    return warp * mask, mask


if __name__ == "__main__":
    key = jax.random.PRNGKey(0)
    kx, kf = jax.random.split(key)
    N, C, H, W = 2, 4, 16, 16
    x = jax.random.normal(kx, (N, C, H, W), jnp.float32)
    # Flows of a few pixels; some samples land out of bounds to exercise the mask.
    flow = 3.0 * jax.random.normal(kf, (N, 2, H, W), jnp.float32)

    fwd = jax.jit(warping_layer_flow_w_mask)
    x_warp, mask = fwd(x, flow)
    jax.block_until_ready((x_warp, mask))

    assert x_warp.shape == (N, C, H, W), x_warp.shape
    assert mask.shape == (N, C, H, W), mask.shape
    assert x_warp.dtype == jnp.float32 and mask.dtype == jnp.float32
    assert bool(jnp.all(jnp.isfinite(x_warp)))
    assert bool(jnp.all((mask == 0.0) | (mask == 1.0)))

    # Validate against a pure-JAX f32 reference.  The kernel's mask uses a 1e-6 epsilon on
    # the >=1.0 threshold (fp knife edge) and the MXU path uses bf16 operands with f32
    # accumulation, so allow rare mask disagreements and a bf16-level value tolerance
    # where the masks agree.
    ref_warp, ref_mask = _reference(x, flow)
    agree = mask == ref_mask
    assert float(jnp.mean(agree.astype(jnp.float32))) > 0.99
    max_err = float(jnp.max(jnp.abs(jnp.where(agree, x_warp - ref_warp, 0.0))))
    assert max_err < 5e-2, max_err

    print("KERNEL_OK")
</pallas_src>

<mosaic_0001>
module attributes {stable_mosaic.version = 11 : i64} {
  func.func @_warp_mask_kernel(%arg0: i32, %arg1: i32, %arg2: memref<1x4x16x16xf32, #tpu.memory_space<vmem>>, %arg3: memref<1x2x256xf32, #tpu.memory_space<vmem>>, %arg4: memref<1x4x256xf32, #tpu.memory_space<vmem>>, %arg5: memref<1x1x256xf32, #tpu.memory_space<vmem>>) attributes {dimension_semantics = [#tpu.dimension_semantics<parallel>, #tpu.dimension_semantics<parallel>], iteration_bounds = array<i64: 2, 1>, scalar_prefetch = 0 : i64, scratch_operands = 0 : i64, tpu.core_type = #tpu.core_type<tc>, window_params = [{transform_indices = @transform_0, window_bounds = array<i64: 1, 4, 16, 16>}, {transform_indices = @transform_1, window_bounds = array<i64: 1, 2, 256>}, {transform_indices = @transform_2, window_bounds = array<i64: 1, 4, 256>}, {transform_indices = @transform_3, window_bounds = array<i64: 1, 1, 256>}]} {
    %c0 = arith.constant 0 : index
    %c0_0 = arith.constant 0 : index
    %c0_1 = arith.constant 0 : index
    %0 = vector.load %arg3[%c0, %c0_0, %c0_1] : memref<1x2x256xf32, #tpu.memory_space<vmem>>, vector<1x2x256xf32>
    %1 = vector.shape_cast %0 : vector<1x2x256xf32> to vector<2x256xf32>
    %2 = vector.extract_strided_slice %1 {offsets = [0, 0], sizes = [1, 256], strides = [1, 1]} : vector<2x256xf32> to vector<1x256xf32>
    %3 = vector.extract_strided_slice %1 {offsets = [1, 0], sizes = [1, 256], strides = [1, 1]} : vector<2x256xf32> to vector<1x256xf32>
    %4 = math.floor %2 : vector<1x256xf32>
    %5 = math.floor %3 : vector<1x256xf32>
    %6 = arith.subf %2, %4 : vector<1x256xf32>
    %cst = arith.constant 1.000000e+00 : f32
    %7 = vector.broadcast %cst : f32 to vector<1x256xf32>
    %8 = arith.subf %7, %6 : vector<1x256xf32>
    %9 = arith.subf %3, %5 : vector<1x256xf32>
    %cst_2 = arith.constant 1.000000e+00 : f32
    %10 = vector.broadcast %cst_2 : f32 to vector<1x256xf32>
    %11 = arith.subf %10, %9 : vector<1x256xf32>
    %12 = arith.fptosi %4 : vector<1x256xf32> to vector<1x256xi32>
    %13 = arith.fptosi %5 : vector<1x256xf32> to vector<1x256xi32>
    %c1_i32 = arith.constant 1 : i32
    %14 = vector.broadcast %c1_i32 : i32 to vector<1x256xi32>
    %15 = arith.addi %12, %14 : vector<1x256xi32>
    %c1_i32_3 = arith.constant 1 : i32
    %16 = vector.broadcast %c1_i32_3 : i32 to vector<1x256xi32>
    %17 = arith.addi %13, %16 : vector<1x256xi32>
    %18 = tpu.iota {dimensions = array<i32: 0>} : vector<16x256xi32>
    %19 = tpu.iota {dimensions = array<i32: 0>} : vector<16x256xi32>
    %20 = vector.broadcast %12 : vector<1x256xi32> to vector<16x256xi32>
    %21 = arith.cmpi eq, %18, %20 : vector<16x256xi32>
    %cst_4 = arith.constant 0.000000e+00 : f32
    %22 = vector.shape_cast %8 : vector<1x256xf32> to vector<1x256xf32>
    %23 = vector.broadcast %22 : vector<1x256xf32> to vector<16x256xf32>
    %24 = vector.broadcast %cst_4 : f32 to vector<16x256xf32>
    %25 = arith.select %21, %23, %24 : vector<16x256xi1>, vector<16x256xf32>
    %26 = vector.broadcast %15 : vector<1x256xi32> to vector<16x256xi32>
    %27 = arith.cmpi eq, %18, %26 : vector<16x256xi32>
    %cst_5 = arith.constant 0.000000e+00 : f32
    %28 = vector.shape_cast %6 : vector<1x256xf32> to vector<1x256xf32>
    %29 = vector.broadcast %28 : vector<1x256xf32> to vector<16x256xf32>
    %30 = vector.broadcast %cst_5 : f32 to vector<16x256xf32>
    %31 = arith.select %27, %29, %30 : vector<16x256xi1>, vector<16x256xf32>
    %32 = arith.addf %25, %31 : vector<16x256xf32>
    %33 = vector.broadcast %13 : vector<1x256xi32> to vector<16x256xi32>
    %34 = arith.cmpi eq, %19, %33 : vector<16x256xi32>
    %cst_6 = arith.constant 0.000000e+00 : f32
    %35 = vector.shape_cast %11 : vector<1x256xf32> to vector<1x256xf32>
    %36 = vector.broadcast %35 : vector<1x256xf32> to vector<16x256xf32>
    %37 = vector.broadcast %cst_6 : f32 to vector<16x256xf32>
    %38 = arith.select %34, %36, %37 : vector<16x256xi1>, vector<16x256xf32>
    %39 = vector.broadcast %17 : vector<1x256xi32> to vector<16x256xi32>
    %40 = arith.cmpi eq, %19, %39 : vector<16x256xi32>
    %cst_7 = arith.constant 0.000000e+00 : f32
    %41 = vector.shape_cast %9 : vector<1x256xf32> to vector<1x256xf32>
    %42 = vector.broadcast %41 : vector<1x256xf32> to vector<16x256xf32>
    %43 = vector.broadcast %cst_7 : f32 to vector<16x256xf32>
    %44 = arith.select %40, %42, %43 : vector<16x256xi1>, vector<16x256xf32>
    %45 = arith.addf %38, %44 : vector<16x256xf32>
    %46 = arith.truncf %32 : vector<16x256xf32> to vector<16x256xbf16>
    %c0_i32 = arith.constant 0 : i32
    %47 = vector.broadcast %c0_i32 : i32 to vector<1x256xi32>
    %48 = arith.cmpi sge, %12, %47 : vector<1x256xi32>
    %c16_i32 = arith.constant 16 : i32
    %49 = vector.broadcast %c16_i32 : i32 to vector<1x256xi32>
    %50 = arith.cmpi slt, %12, %49 : vector<1x256xi32>
    %51 = arith.andi %48, %50 : vector<1x256xi1>
    %c0_i32_8 = arith.constant 0 : i32
    %52 = vector.broadcast %c0_i32_8 : i32 to vector<1x256xi32>
    %53 = arith.cmpi sge, %15, %52 : vector<1x256xi32>
    %c16_i32_9 = arith.constant 16 : i32
    %54 = vector.broadcast %c16_i32_9 : i32 to vector<1x256xi32>
    %55 = arith.cmpi slt, %15, %54 : vector<1x256xi32>
    %56 = arith.andi %53, %55 : vector<1x256xi1>
    %c0_i32_10 = arith.constant 0 : i32
    %57 = vector.broadcast %c0_i32_10 : i32 to vector<1x256xi32>
    %58 = arith.cmpi sge, %13, %57 : vector<1x256xi32>
    %c16_i32_11 = arith.constant 16 : i32
    %59 = vector.broadcast %c16_i32_11 : i32 to vector<1x256xi32>
    %60 = arith.cmpi slt, %13, %59 : vector<1x256xi32>
    %61 = arith.andi %58, %60 : vector<1x256xi1>
    %c0_i32_12 = arith.constant 0 : i32
    %62 = vector.broadcast %c0_i32_12 : i32 to vector<1x256xi32>
    %63 = arith.cmpi sge, %17, %62 : vector<1x256xi32>
    %c16_i32_13 = arith.constant 16 : i32
    %64 = vector.broadcast %c16_i32_13 : i32 to vector<1x256xi32>
    %65 = arith.cmpi slt, %17, %64 : vector<1x256xi32>
    %66 = arith.andi %63, %65 : vector<1x256xi1>
    %cst_14 = arith.constant 0.000000e+00 : f32
    %67 = vector.broadcast %cst_14 : f32 to vector<1x256xf32>
    %68 = arith.select %51, %8, %67 : vector<1x256xi1>, vector<1x256xf32>
    %cst_15 = arith.constant 0.000000e+00 : f32
    %69 = vector.broadcast %cst_15 : f32 to vector<1x256xf32>
    %70 = arith.select %56, %6, %69 : vector<1x256xi1>, vector<1x256xf32>
    %71 = arith.addf %68, %70 : vector<1x256xf32>
    %cst_16 = arith.constant 0.000000e+00 : f32
    %72 = vector.broadcast %cst_16 : f32 to vector<1x256xf32>
    %73 = arith.select %61, %11, %72 : vector<1x256xi1>, vector<1x256xf32>
    %cst_17 = arith.constant 0.000000e+00 : f32
    %74 = vector.broadcast %cst_17 : f32 to vector<1x256xf32>
    %75 = arith.select %66, %9, %74 : vector<1x256xi1>, vector<1x256xf32>
    %76 = arith.addf %73, %75 : vector<1x256xf32>
    %77 = arith.mulf %76, %71 : vector<1x256xf32>
    %cst_18 = arith.constant 0.999998986 : f32
    %78 = vector.broadcast %cst_18 : f32 to vector<1x256xf32>
    %79 = arith.cmpf oge, %77, %78 : vector<1x256xf32>
    %80 = arith.extui %79 : vector<1x256xi1> to vector<1x256xi32>
    %81 = arith.sitofp %80 : vector<1x256xi32> to vector<1x256xf32>
    %c0_19 = arith.constant 0 : index
    %c0_20 = arith.constant 0 : index
    %c0_21 = arith.constant 0 : index
    %c0_22 = arith.constant 0 : index
    %82 = vector.load %arg2[%c0_19, %c0_20, %c0_21, %c0_22] : memref<1x4x16x16xf32, #tpu.memory_space<vmem>>, vector<1x1x16x16xf32>
    %83 = vector.shape_cast %82 : vector<1x1x16x16xf32> to vector<16x16xf32>
    %84 = arith.truncf %83 : vector<16x16xf32> to vector<16x16xbf16>
    %cst_23 = arith.constant dense<0.000000e+00> : vector<16x256xf32>
    %85 = tpu.matmul %84, %46, %cst_23 {dimension_numbers = #tpu.dot_dimension_numbers<[1], [0], [0], [1], [0, 0, 1, 1], [], []>} : vector<16x16xbf16>, vector<16x256xbf16>, vector<16x256xf32> -> vector<16x256xf32>
    %86 = arith.mulf %85, %45 : vector<16x256xf32>
    %cst_24 = arith.constant dense<0.000000e+00> : vector<256xf32>
    %87 = vector.multi_reduction <add>, %86, %cst_24 [0] : vector<16x256xf32> to vector<256xf32>
    %88 = vector.shape_cast %87 : vector<256xf32> to vector<1x256xf32>
    %c0_25 = arith.constant 0 : index
    %c1 = arith.constant 1 : index
    %c0_26 = arith.constant 0 : index
    %c0_27 = arith.constant 0 : index
    %89 = vector.load %arg2[%c0_25, %c1, %c0_26, %c0_27] : memref<1x4x16x16xf32, #tpu.memory_space<vmem>>, vector<1x1x16x16xf32>
    %90 = vector.shape_cast %89 : vector<1x1x16x16xf32> to vector<16x16xf32>
    %91 = arith.truncf %90 : vector<16x16xf32> to vector<16x16xbf16>
    %cst_28 = arith.constant dense<0.000000e+00> : vector<16x256xf32>
    %92 = tpu.matmul %91, %46, %cst_28 {dimension_numbers = #tpu.dot_dimension_numbers<[1], [0], [0], [1], [0, 0, 1, 1], [], []>} : vector<16x16xbf16>, vector<16x256xbf16>, vector<16x256xf32> -> vector<16x256xf32>
    %93 = arith.mulf %92, %45 : vector<16x256xf32>
    %cst_29 = arith.constant dense<0.000000e+00> : vector<256xf32>
    %94 = vector.multi_reduction <add>, %93, %cst_29 [0] : vector<16x256xf32> to vector<256xf32>
    %95 = vector.shape_cast %94 : vector<256xf32> to vector<1x256xf32>
    %c0_30 = arith.constant 0 : index
    %c2 = arith.constant 2 : index
    %c0_31 = arith.constant 0 : index
    %c0_32 = arith.constant 0 : index
    %96 = vector.load %arg2[%c0_30, %c2, %c0_31, %c0_32] : memref<1x4x16x16xf32, #tpu.memory_space<vmem>>, vector<1x1x16x16xf32>
    %97 = vector.shape_cast %96 : vector<1x1x16x16xf32> to vector<16x16xf32>
    %98 = arith.truncf %97 : vector<16x16xf32> to vector<16x16xbf16>
    %cst_33 = arith.constant dense<0.000000e+00> : vector<16x256xf32>
    %99 = tpu.matmul %98, %46, %cst_33 {dimension_numbers = #tpu.dot_dimension_numbers<[1], [0], [0], [1], [0, 0, 1, 1], [], []>} : vector<16x16xbf16>, vector<16x256xbf16>, vector<16x256xf32> -> vector<16x256xf32>
    %100 = arith.mulf %99, %45 : vector<16x256xf32>
    %cst_34 = arith.constant dense<0.000000e+00> : vector<256xf32>
    %101 = vector.multi_reduction <add>, %100, %cst_34 [0] : vector<16x256xf32> to vector<256xf32>
    %102 = vector.shape_cast %101 : vector<256xf32> to vector<1x256xf32>
    %c0_35 = arith.constant 0 : index
    %c3 = arith.constant 3 : index
    %c0_36 = arith.constant 0 : index
    %c0_37 = arith.constant 0 : index
    %103 = vector.load %arg2[%c0_35, %c3, %c0_36, %c0_37] : memref<1x4x16x16xf32, #tpu.memory_space<vmem>>, vector<1x1x16x16xf32>
    %104 = vector.shape_cast %103 : vector<1x1x16x16xf32> to vector<16x16xf32>
    %105 = arith.truncf %104 : vector<16x16xf32> to vector<16x16xbf16>
    %cst_38 = arith.constant dense<0.000000e+00> : vector<16x256xf32>
    %106 = tpu.matmul %105, %46, %cst_38 {dimension_numbers = #tpu.dot_dimension_numbers<[1], [0], [0], [1], [0, 0, 1, 1], [], []>} : vector<16x16xbf16>, vector<16x256xbf16>, vector<16x256xf32> -> vector<16x256xf32>
    %107 = arith.mulf %106, %45 : vector<16x256xf32>
    %cst_39 = arith.constant dense<0.000000e+00> : vector<256xf32>
    %108 = vector.multi_reduction <add>, %107, %cst_39 [0] : vector<16x256xf32> to vector<256xf32>
    %109 = vector.shape_cast %108 : vector<256xf32> to vector<1x256xf32>
    %110 = tpu.concatenate %88, %95, %102, %109 in 0 : vector<1x256xf32>, vector<1x256xf32>, vector<1x256xf32>, vector<1x256xf32> -> vector<4x256xf32>
    %111 = vector.broadcast %81 : vector<1x256xf32> to vector<4x256xf32>
    %112 = arith.mulf %110, %111 : vector<4x256xf32>
    %c0_40 = arith.constant 0 : index
    %c0_41 = arith.constant 0 : index
    %c0_42 = arith.constant 0 : index
    %113 = vector.load %arg4[%c0_40, %c0_41, %c0_42] : memref<1x4x256xf32, #tpu.memory_space<vmem>>, vector<1x4x256xf32>
    %114 = vector.shape_cast %113 : vector<1x4x256xf32> to vector<4x256xf32>
    %115 = vector.shape_cast %112 : vector<4x256xf32> to vector<1x4x256xf32>
    tpu.vector_store %arg4[%c0_40, %c0_41, %c0_42], %115 {strides = array<i32>} : memref<1x4x256xf32, #tpu.memory_space<vmem>>, vector<1x4x256xf32>,
    %c0_43 = arith.constant 0 : index
    %c0_44 = arith.constant 0 : index
    %c0_45 = arith.constant 0 : index
    %116 = vector.load %arg5[%c0_43, %c0_44, %c0_45] : memref<1x1x256xf32, #tpu.memory_space<vmem>>, vector<1x1x256xf32>
    %117 = vector.shape_cast %116 : vector<1x1x256xf32> to vector<1x256xf32>
    %118 = vector.shape_cast %81 : vector<1x256xf32> to vector<1x1x256xf32>
    tpu.vector_store %arg5[%c0_43, %c0_44, %c0_45], %118 {strides = array<i32>} : memref<1x1x256xf32, #tpu.memory_space<vmem>>, vector<1x1x256xf32>,
    return
  }
  func.func @transform_0(%arg0: i32, %arg1: i32) -> (i32, i32, i32, i32) {
    %c0_i32 = arith.constant 0 : i32
    %c0_i32_0 = arith.constant 0 : i32
    %c0_i32_1 = arith.constant 0 : i32
    %c0_i32_2 = arith.constant 0 : i32
    return %arg0, %c0_i32, %c0_i32_0, %c0_i32_1 : i32, i32, i32, i32
  }
  func.func @transform_1(%arg0: i32, %arg1: i32) -> (i32, i32, i32) {
    %c0_i32 = arith.constant 0 : i32
    %c0_i32_0 = arith.constant 0 : i32
    return %arg0, %c0_i32, %arg1 : i32, i32, i32
  }
  func.func @transform_2(%arg0: i32, %arg1: i32) -> (i32, i32, i32) {
    %c0_i32 = arith.constant 0 : i32
    %c0_i32_0 = arith.constant 0 : i32
    return %arg0, %c0_i32, %arg1 : i32, i32, i32
  }
  func.func @transform_3(%arg0: i32, %arg1: i32) -> (i32, i32, i32) {
    %c0_i32 = arith.constant 0 : i32
    %c0_i32_0 = arith.constant 0 : i32
    return %arg0, %c0_i32, %arg1 : i32, i32, i32
  }
}

</mosaic_0001>

<bundles_post_ra>
// kernel: warping_layer_flow_w_mask.1
= control target key start
LH: loop header
LB: loop body
LE: loop exit
PB: predicated region body
PF: predicated region fallthrough
CT: control target
= control target key end

     0   :  { %s1026_s12 = smov 0   ;;  %s1028_s13 = smov 0   ;;  %s1180_s0 = inlined_call_operand.vmem [shape: f32[2,4,16,16], index: 0, kind: input, shape index: {}]   ;;  %s1181_s1 = inlined_call_operand.vmem [shape: f32[2,2,256], index: 1, kind: input, shape index: {}]   ;;  %s1182_s2 = inlined_call_operand.vmem [shape: f32[2,4,256], index: 2, kind: output, shape index: {0}]   ;;  %s1183_s3 = inlined_call_operand.vmem [shape: f32[2,1,256], index: 3, kind: output, shape index: {1}]  }
   0x1   :  { %s1030_s14 = smov 0  }
   0x2 LB: > { %s26_s15 = sadd.s32 1, %s997_s13  ;;  %p926_p0 = scmp.ge.s32.totalorder %s1001_s14, 1  ;;  %s1001_s14 = sphi %s1030_s14, %s14_s14   ;;  %s997_s13 = sphi %s1028_s13, %s1185_s13   ;;  %s993_s12 = sphi %s1026_s12, %s1184_s12  }
   0x3   : > { %p28_p1 = scmp.ge.s32.totalorder %s26_s15, 2  ;;  %p173_p2 = scmp.lt.s32.totalorder %s1001_s14, 3 }
   0x5   : > { %s1187_s15 = smov (%p28_p1, %s26_s15), 0  ;;  %p174_p3 = pnand %p926_p0, %p173_p2 }
   0x6   : > { %p218_p4 = scmp.lt.s32.totalorder (!%p174_p3), %s993_s12, 1  ;;  %v259_v0 = vlaneseq (!%p174_p3)  ;;  %v1003_v1 = vmov (!%p174_p3), 0   ;;  %vm461_vm8 = vcmask (!%p174_p3), 130048   ;;  %v1004_v60 = vmov (!%p174_p3), 1966171168  }
   0x7   : > { %177 = sbr.rel (%p174_p3) target bundleno = 286 (0x11e), region = 28  ;;  %497 = vmatprep.mubr.bf16.mxu0 (!%p174_p3), %v1003_v1  ;;  %565 = vmatprep.mubr.bf16.mxu1 (!%p174_p3), %v1003_v1  ;;  %v766_v61 = vunpack.c.l.s4 (!%p174_p3), %v1004_v60 }
   0x8   : > { %v1050_v2 = vshrl.u32 (!%p174_p3), %v259_v0, 7 }
   0x9   : > { %v767_v62 = vunpack.c.0.s8 (!%p174_p3), %v766_v61 }
   0xa   : > { %v264_v5 = vsub.s32 (!%p174_p3), 0, %v1050_v2  ;;  %v268_v6 = vsub.s32 (!%p174_p3), 2, %v1050_v2  ;;  %v1070_v14 = vadd.s32 (!%p174_p3), 8, %v1050_v2 }
   0xb   : > { %v770_v63 = vsub.s32 (!%p174_p3), %v767_v62, %v1050_v2 }
   0xe   : > { %s1189_s12 = smov (!%p218_p4, %s993_s12), 1 }
   0xf   : > { %s948_s16 = sshll.u32 %s1189_s12, 2  ;;  %s947_s20 = sshll.u32 %s1189_s12, 6 }
  0x10   : > { %s231_s19 = scalar_lea.vmem %s1181_s1, %s948_s16  ;;  %s1086_s23 = scalar_lea.vmem %s1180_s0, %s947_s20 }
  0x11   : > { %v253_v3 = vld [vmem:[%s231_s19] sm:$0xf]  ;;  %v459_v42 = vld [vmem:[%s1086_s23 + $0x8] sm:$0xff]  ;;  %v936_v43 = vld [vmem:[%s1086_s23 + $0x10] sm:$0xff]  ;;  %s933_s24 = sshll.u32 %s1189_s12, 1  ;;  %s949_s28 = sshll.u32 %s1189_s12, 3 }
  0x12   : > { %v254_v4 = vfloor.f32 %v253_v3  ;;  %v458_v39 = vld [vmem:[%s1086_s23] sm:$0xff]  ;;  %v937_v44 = vld [vmem:[%s1086_s23 + $0x18] sm:$0xff]  ;;  %v940_v50 = vld [vmem:[%s1086_s23 + $0x28] sm:$0xff]  ;;  %s250_s27 = scalar_lea.vmem %s1183_s3, %s933_s24  ;;  %s241_s4 = scalar_lea.vmem %s1182_s2, %s949_s28 }
  0x13   : > { %v460_v47 = vpack.c.bf16 %v459_v42, %v458_v39  ;;  %v529_v48 = vpack.c.bf16 %v937_v44, %v936_v43  ;;  %v939_v49 = vld [vmem:[%s1086_s23 + $0x20] sm:$0xff]  ;;  %v942_v51 = vld [vmem:[%s1086_s23 + $0x30] sm:$0xff]  ;;  %v943_v52 = vld [vmem:[%s1086_s23 + $0x38] sm:$0xff] }
  0x14   : > { %v1057_v7 = vsub.f32 %v253_v3, %v254_v4  ;;  %v950_v8 = vtrunc.f32 %v254_v4  ;;  %v597_v53 = vpack.c.bf16 %v940_v50, %v939_v49  ;;  %v665_v54 = vpack.c.bf16 %v943_v52, %v942_v51 }
  0x16   : > { %v1060_v9 = vsub.f32 1.0, %v1057_v7  ;;  %v1062_v10 = vcvt.f32.s32 %v950_v8  ;;  %v333_v11 = vrot.slane %v1057_v7, %v268_v6  ;;  %v329_v12 = vrot.slane %v1057_v7, %v264_v5 }
  0x18   : > { %v1067_v13 = vadd.s32 1, %v1062_v10  ;;  %v269_v15 = vrot.slane %v1062_v10, %v268_v6  ;;  %v290_v16 = vrot.slane %v1060_v9, %v268_v6  ;;  %v265_v17 = vrot.slane %v1062_v10, %v264_v5 }
  0x19   : > { %v286_v18 = vrot.slane %v1060_v9, %v264_v5  ;;  %v343_v23 = vrot.slane %v333_v11, %v264_v5  ;;  %v339_v26 = vrot.slane %v329_v12, %v264_v5  ;;  %vm442_vm9 = vcmp.ge.s32.totalorder %v1062_v10, 0 }
  0x1a   : > { %v277_v19 = vrot.slane %v269_v15, %v264_v5  ;;  %v300_v20 = vrot.slane %v290_v16, %v264_v5  ;;  %v312_v21 = vrot.slane %v1067_v13, %v268_v6  ;;  %v308_v22 = vrot.slane %v1067_v13, %v264_v5 }
  0x1b   : > { %v273_v24 = vrot.slane %v265_v17, %v264_v5  ;;  %v296_v25 = vrot.slane %v286_v18, %v264_v5  ;;  %vm443_vm10 = vcmp.lt.s32.totalorder %v1062_v10, 16  ;;  %vm445_vm11 = vcmp.ge.s32.totalorder %v1067_v13, 0 }
  0x1c   : > { %vm279_vm0 = vcmp.eq.s32.totalorder %v1050_v2, %v277_v19  ;;  %vm281_vm1 = vcmp.eq.s32.totalorder %v1070_v14, %v277_v19  ;;  %v320_v27 = vrot.slane %v312_v21, %v264_v5  ;;  %v316_v28 = vrot.slane %v308_v22, %v264_v5  ;;  %vm444_vm13 = vmand %vm442_vm9, %vm443_vm10 }
  0x1d   : > { %v302_v29 = vsel %vm279_vm0, %v300_v20, 0.0  ;;  %v304_v30 = vsel %vm281_vm1, %v300_v20, 0.0  ;;  %vm278_vm2 = vcmp.eq.s32.totalorder %v1050_v2, %v273_v24  ;;  %vm280_vm3 = vcmp.eq.s32.totalorder %v1070_v14, %v273_v24 }
  0x1e   : > { %vm322_vm4 = vcmp.eq.s32.totalorder %v1050_v2, %v320_v27  ;;  %vm324_vm5 = vcmp.eq.s32.totalorder %v1070_v14, %v320_v27  ;;  %v301_v31 = vsel %vm278_vm2, %v296_v25, 0.0  ;;  %v303_v32 = vsel %vm280_vm3, %v296_v25, 0.0 }
  0x1f   : > { %v345_v33 = vsel %vm322_vm4, %v343_v23, 0.0  ;;  %v347_v34 = vsel %vm324_vm5, %v343_v23, 0.0  ;;  %vm321_vm6 = vcmp.eq.s32.totalorder %v1050_v2, %v316_v28  ;;  %vm323_vm7 = vcmp.eq.s32.totalorder %v1070_v14, %v316_v28 }
  0x20   : > { %v349_v35 = vadd.f32 %v345_v33, %v302_v29  ;;  %v351_v36 = vadd.f32 %v347_v34, %v304_v30  ;;  %v344_v37 = vsel %vm321_vm6, %v339_v26, 0.0  ;;  %v346_v38 = vsel %vm323_vm7, %v339_v26, 0.0 }
  0x21   : > { %v348_v40 = vadd.f32 %v344_v37, %v301_v31  ;;  %v350_v41 = vadd.f32 %v346_v38, %v303_v32  ;;  %vm446_vm12 = vcmp.lt.s32.totalorder %v1067_v13, 16  ;;  %v448_v55 = vsel %vm444_vm13, %v1060_v9, 0.0 }
  0x22   : > { %v441_v45 = vpack.c.bf16 %v351_v36, %v349_v35  ;;  %vm447_vm14 = vmand %vm445_vm11, %vm446_vm12  ;;  %vm776_vm0 = vcmp.lt.s32.totalorder %v259_v0, 256  ;;  %v1122_v6 = vsub.s32 1, %v1050_v2  ;;  %v1129_v12 = vsub.s32 3, %v1050_v2 }
  0x23   : > { %v440_v46 = vpack.c.bf16 %v350_v41, %v348_v40  ;;  %v449_v56 = vsel %vm447_vm14, %v1057_v7, 0.0  ;;  %vm730_vm9 = vcmask 1040384   ;;  %vm733_vm10 = vcmask 1041408  }
  0x24   : > { %465 = vmatprep.subr.bf16.mxu0 %v441_v45  ;;  %533 = vmatprep.subr.bf16.mxu1 %v441_v45  ;;  %v450_v57 = vadd.f32 %v449_v56, %v448_v55  ;;  %v355_v8 = vrot.slane %v1062_v10, %v1122_v6  ;;  %v397_v11 = vrot.slane %v1067_v13, %v1122_v6  ;;  %vm736_vm11 = vcmask 1042432  }
  0x25   : > { %466 = vmatpush1.bf16.msra.mxu0 %v440_v46  ;;  %534 = vmatpush1.bf16.msra.mxu1 %v440_v46  ;;  %v375_v15 = vrot.slane %v1060_v9, %v1122_v6  ;;  %v417_v0 = vrot.slane %v1057_v7, %v1122_v6  ;;  %v359_v18 = vrot.slane %v1062_v10, %v1129_v12 }
  0x26   : > { %601 = vmatprep.subr.bf16.mxu0 %v441_v45  ;;  %669 = vmatprep.subr.bf16.mxu1 %v441_v45  ;;  %v452_v58 = vrot.slane %v450_v57, 7  ;;  %v363_v16 = vrot.slane %v355_v8, %v1122_v6  ;;  %v405_v17 = vrot.slane %v397_v11, %v1122_v6  ;;  %v401_v19 = vrot.slane %v1067_v13, %v1129_v12 }
  0x27   : > { %v385_v20 = vrot.slane %v375_v15, %v1122_v6  ;;  %v427_v21 = vrot.slane %v417_v0, %v1122_v6  ;;  %v379_v22 = vrot.slane %v1060_v9, %v1129_v12  ;;  %v421_v23 = vrot.slane %v1057_v7, %v1129_v12 }
  0x28   : > { %935 = vmatmul.mubr.msk.bf16.vlgmr.msra.gmra.mrb[0].mxu0 %vm461_vm8, %v460_v47  ;;  %938 = vmatmul.mubr.msk.bf16.vlgmr.msra.gmra.mrb[0].mxu1 %vm461_vm8, %v529_v48  ;;  %v454_v59 = vmul.f32 %v452_v58, %v450_v57  ;;  %vm368_vm1 = vcmp.eq.s32.totalorder %v1050_v2, %v363_v16  ;;  %vm410_vm2 = vcmp.eq.s32.totalorder %v1050_v2, %v405_v17 }
  0x29   : > { %602 = vmatpush1.bf16.msra.mxu0 %v440_v46  ;;  %670 = vmatpush1.bf16.msra.mxu1 %v440_v46  ;;  %v367_v24 = vrot.slane %v359_v18, %v1122_v6  ;;  %v409_v10 = vrot.slane %v401_v19, %v1122_v6  ;;  %v390_v25 = vsel %vm368_vm1, %v385_v20, 0.0  ;;  %v432_v13 = vsel %vm410_vm2, %v427_v21, 0.0 }
  0x2a   : > { %633 = vmatprep.mubr.bf16.mxu0 %v1003_v1  ;;  %701 = vmatprep.mubr.bf16.mxu1 %v1003_v1  ;;  %vm455_vm15 = vcmp.ge.f32.partialorder %v454_v59, 0.999999  ;;  %v1005_v1 = vmov 0.0   ;;  %v389_v26 = vrot.slane %v379_v22, %v1122_v6  ;;  %v431_v27 = vrot.slane %v421_v23, %v1122_v6 }
  0x2b   : > { %v1114_v3 = vsel %vm455_vm15, 1.0, %v1005_v1  ;;  %vm370_vm3 = vcmp.eq.s32.totalorder %v1070_v14, %v363_v16  ;;  %vm412_vm4 = vcmp.eq.s32.totalorder %v1070_v14, %v405_v17  ;;  %vm369_vm5 = vcmp.eq.s32.totalorder %v1050_v2, %v367_v24 }
  0x2c   : > { %v771_v4 = vrot.slane %v1114_v3, %v770_v63  ;;  %vm411_vm6 = vcmp.eq.s32.totalorder %v1050_v2, %v409_v10  ;;  %vm371_vm7 = vcmp.eq.s32.totalorder %v1070_v14, %v367_v24  ;;  %v436_v7 = vadd.f32 %v432_v13, %v390_v25 }
  0x2d   : > { %v392_v9 = vsel %vm370_vm3, %v385_v20, 0.0  ;;  %v434_v28 = vsel %vm412_vm4, %v427_v21, 0.0  ;;  %v391_v29 = vsel %vm369_vm5, %v389_v26, 0.0  ;;  %v433_v30 = vsel %vm411_vm6, %v431_v27, 0.0 }
  0x2e   : > { %v772_v5 = vcombine.high %v771_v4, %v771_v4  ;;  %v393_v31 = vsel %vm371_vm7, %v389_v26, 0.0  ;;  %v438_v33 = vadd.f32 %v434_v28, %v392_v9  ;;  %v437_v36 = vadd.f32 %v433_v30, %v391_v29 }
  0x30   : > { %941 = vmatmul.mubr.msk.bf16.vlgmr.msra.gmra.mrb[4].mxu0 %vm461_vm8, %v597_v53  ;;  %944 = vmatmul.mubr.msk.bf16.vlgmr.msra.gmra.mrb[4].mxu1 %vm461_vm8, %v665_v54  ;;  %778 = vst.msk [vmem:[%s250_s27] sm:$0x3] %vm776_vm0, %v772_v5  ;;  %vm413_vm8 = vcmp.eq.s32.totalorder %v1070_v14, %v409_v10 }
  0x31   : > { %v435_v32 = vsel %vm413_vm8, %v431_v27, 0.0 }
  0x32   : > { %v439_v37 = vadd.f32 %v435_v32, %v393_v31 }
  0xfb   : > { %v499_v34 = vpop.f32.mrb[0].mxu0  ;;  %v567_v35 = vpop.f32.mrb[0].mxu1 }
  0xfc   : > { %v576_v38 = vmul.f32 %v567_v35, %v436_v7  ;;  %v501_v39 = vpop.f32.mrb[1].mxu0  ;;  %v569_v40 = vpop.f32.mrb[1].mxu1  ;;  %v508_v42 = vmul.f32 %v499_v34, %v436_v7 }
  0xfd   : > { %v503_v2 = vpop.f32.mrb[2].mxu0  ;;  %v571_v41 = vpop.f32.mrb[2].mxu1  ;;  %v509_v46 = vmul.f32 %v501_v39, %v437_v36  ;;  %v577_v47 = vmul.f32 %v569_v40, %v437_v36 }
  0xfe   : > { %v510_v43 = vmul.f32 %v503_v2, %v438_v33  ;;  %v578_v14 = vmul.f32 %v571_v41, %v438_v33  ;;  %v505_v44 = vpop.f32.mrb[3].mxu0  ;;  %v573_v45 = vpop.f32.mrb[3].mxu1 }
  0xff   : > { %v511_v48 = vmul.f32 %v505_v44, %v439_v37  ;;  %v579_v49 = vmul.f32 %v573_v45, %v439_v37 }
 0x100   : > { %v512_v50 = vadd.f32 %v510_v43, %v508_v42  ;;  %v580_v51 = vadd.f32 %v578_v14, %v576_v38 }
 0x101   : > { %v519_v52 = vadd.f32 %v511_v48, %v509_v46  ;;  %v587_v53 = vadd.f32 %v579_v49, %v577_v47 }
 0x102   : > { %v513_v54 = vrot.slane %v512_v50, 4  ;;  %v581_v55 = vrot.slane %v580_v51, 4 }
 0x103   : > { %v520_v56 = vrot.slane %v519_v52, 4  ;;  %v588_v57 = vrot.slane %v587_v53, 4  ;;  %v635_v58 = vpop.f32.mrb[4].mxu0  ;;  %v703_v59 = vpop.f32.mrb[4].mxu1 }
 0x104   : > { %v514_v60 = vadd.f32 %v513_v54, %v512_v50  ;;  %v582_v61 = vadd.f32 %v581_v55, %v580_v51  ;;  %v644_v62 = vmul.f32 %v635_v58, %v436_v7  ;;  %v712_v63 = vmul.f32 %v703_v59, %v436_v7  ;;  %v637_v1 = vpop.f32.mrb[5].mxu0  ;;  %v705_v4 = vpop.f32.mrb[5].mxu1 }
 0x105   : > { %v521_v5 = vadd.f32 %v520_v56, %v519_v52  ;;  %v589_v8 = vadd.f32 %v588_v57, %v587_v53  ;;  %v645_v11 = vmul.f32 %v637_v1, %v437_v36  ;;  %v713_v15 = vmul.f32 %v705_v4, %v437_v36  ;;  %v639_v0 = vpop.f32.mrb[6].mxu0  ;;  %v707_v16 = vpop.f32.mrb[6].mxu1 }
 0x106   : > { %v515_v17 = vrot.slane %v514_v60, 2  ;;  %v583_v18 = vrot.slane %v582_v61, 2  ;;  %v646_v19 = vmul.f32 %v639_v0, %v438_v33  ;;  %v714_v20 = vmul.f32 %v707_v16, %v438_v33  ;;  %v641_v21 = vpop.f32.mrb[7].mxu0  ;;  %v709_v22 = vpop.f32.mrb[7].mxu1 }
 0x107   : > { %v522_v23 = vrot.slane %v521_v5, 2  ;;  %v590_v24 = vrot.slane %v589_v8, 2  ;;  %v647_v10 = vmul.f32 %v641_v21, %v439_v37  ;;  %v715_v25 = vmul.f32 %v709_v22, %v439_v37 }
 0x108   : > { %v516_v13 = vadd.f32 %v515_v17, %v514_v60  ;;  %v584_v26 = vadd.f32 %v583_v18, %v582_v61  ;;  %v648_v27 = vadd.f32 %v646_v19, %v644_v62  ;;  %v716_v7 = vadd.f32 %v714_v20, %v712_v63 }
 0x109   : > { %v523_v9 = vadd.f32 %v522_v23, %v521_v5  ;;  %v591_v28 = vadd.f32 %v590_v24, %v589_v8  ;;  %v655_v29 = vadd.f32 %v647_v10, %v645_v11  ;;  %v723_v30 = vadd.f32 %v715_v25, %v713_v15 }
 0x10a   : > { %v517_v31 = vrot.slane %v516_v13, 1  ;;  %v585_v32 = vrot.slane %v584_v26, 1  ;;  %v649_v34 = vrot.slane %v648_v27, 4  ;;  %v717_v35 = vrot.slane %v716_v7, 4 }
 0x10b   : > { %v524_v36 = vrot.slane %v523_v9, 1  ;;  %v592_v33 = vrot.slane %v591_v28, 1  ;;  %v656_v38 = vrot.slane %v655_v29, 4  ;;  %v724_v39 = vrot.slane %v723_v30, 4 }
 0x10c   : > { %v518_v40 = vadd.f32 %v517_v31, %v516_v13  ;;  %v586_v2 = vadd.f32 %v585_v32, %v584_v26  ;;  %v650_v41 = vadd.f32 %v649_v34, %v648_v27  ;;  %v718_v37 = vadd.f32 %v717_v35, %v716_v7 }
 0x10d   : > { %v525_v42 = vadd.f32 %v524_v36, %v523_v9  ;;  %v593_v43 = vadd.f32 %v592_v33, %v591_v28  ;;  %v657_v14 = vadd.f32 %v656_v38, %v655_v29  ;;  %v725_v44 = vadd.f32 %v724_v39, %v723_v30 }
 0x10e   : > { %v731_v45 = vsel %vm730_vm9, %v518_v40, %v586_v2  ;;  %v651_v46 = vrot.slane %v650_v41, 2  ;;  %v719_v47 = vrot.slane %v718_v37, 2  ;;  %v743_v53 = vrot.slane %v1114_v3, %v1122_v6 }
 0x10f   : > { %v732_v48 = vsel %vm730_vm9, %v525_v42, %v593_v43  ;;  %v658_v49 = vrot.slane %v657_v14, 2  ;;  %v726_v50 = vrot.slane %v725_v44, 2  ;;  %v747_v56 = vrot.slane %v1114_v3, %v1129_v12 }
 0x110   : > { %v652_v51 = vadd.f32 %v651_v46, %v650_v41  ;;  %v720_v52 = vadd.f32 %v719_v47, %v718_v37  ;;  %v753_v63 = vrot.slane %v743_v53, %v1122_v6 }
 0x111   : > { %v659_v54 = vadd.f32 %v658_v49, %v657_v14  ;;  %v727_v55 = vadd.f32 %v726_v50, %v725_v44  ;;  %v757_v5 = vrot.slane %v747_v56, %v1122_v6 }
 0x112   : > { %v653_v57 = vrot.slane %v652_v51, 1  ;;  %v721_v58 = vrot.slane %v720_v52, 1 }
 0x113   : > { %v660_v59 = vrot.slane %v659_v54, 1  ;;  %v728_v60 = vrot.slane %v727_v55, 1 }
 0x114   : > { %v654_v61 = vadd.f32 %v653_v57, %v652_v51  ;;  %v722_v62 = vadd.f32 %v721_v58, %v720_v52 }
 0x115   : > { %v661_v1 = vadd.f32 %v660_v59, %v659_v54  ;;  %v729_v4 = vadd.f32 %v728_v60, %v727_v55 }
 0x116   : > { %v734_v8 = vsel %vm733_vm10, %v731_v45, %v654_v61 }
 0x117   : > { %v737_v11 = vsel %vm736_vm11, %v734_v8, %v722_v62  ;;  %v735_v15 = vsel %vm733_vm10, %v732_v48, %v661_v1 }
 0x118   : > { %v758_v3 = vmul.f32 %v753_v63, %v737_v11  ;;  %v738_v12 = vsel %vm736_vm11, %v735_v15, %v729_v4 }
 0x119   : > { %v759_v0 = vmul.f32 %v757_v5, %v738_v12 }
 0x11b   : > { %v762_v16 = vcombine.low %v758_v3, %v759_v0 }
 0x11d   : > { %764 = vst [vmem:[%s241_s4] sm:$0xff] %v762_v16 }
 0x11e PF: > { %s14_s14 = sadd.s32 1, %s1001_s14   ;;  %s1184_s12 = smov %s997_s13 }
 0x11f   : > { %p11_p5 = scmp.ge.s32.totalorder %s14_s14, 4   ;;  %s1185_s13 = smov %s1187_s15 }
 0x121   :  { %13 = sbr.rel (!%p11_p5) target bundleno = 2 (0x2), region = 76 }

</bundles_post_ra>
